<compile_context>
chip_gen: v7x
topology: tpu7x:2x2x1
jax: 0.10.0
libtpu: 0.0.40
codegen_flags: <defaults>
</compile_context>

<pallas_src>
import functools

import jax
import jax.numpy as jnp
from jax import lax
from jax.experimental import pallas as pl
from jax.experimental.pallas import tpu as pltpu


def summary_kernel(xo_ref, xn_ref, wo_ref, wn_ref, b_ref,
                   num_out_ref, den_out_ref,
                   num_acc, den_acc, *, n_total, tile_n, need_mask):
    i = pl.program_id(1)                       # position inside this core's chunk

    @pl.when(i == 0)
    def _init():
        num_acc[...] = jnp.zeros_like(num_acc)
        den_acc[...] = jnp.zeros_like(den_acc)

    xo = xo_ref[...].astype(jnp.float32)       # (tile_n, ino)
    xn = xn_ref[...].astype(jnp.float32)       # (tile_n, inn)
    wo = wo_ref[...].astype(jnp.float32)       # (ino, 1)  weight column
    wn = wn_ref[...].astype(jnp.float32)       # (inn, 1)  weight column

    # logits = cat(xo, xn) @ W^T + b  ==  xo @ wo + xn @ wn + b, per row.
    # Contract the feature axis on the MXU (idle otherwise); the XLU cross-lane
    # reduction path this replaces was the likely binding slot on v6e/v7x.
    logits = (jnp.dot(xo, wo, preferred_element_type=jnp.float32)
              + jnp.dot(xn, wn, preferred_element_type=jnp.float32)
              + b_ref[0, 0])                   # (tile_n, 1)

    # tanh bounds logits to [-1, 1] -> exp in [0.37, 2.72]: a single streaming
    # softmax pass (no running max) is numerically safe with f32 accumulators.
    e = jnp.exp(jnp.tanh(logits))              # (tile_n, 1)  EUP ops

    def _accumulate(e_v, xn_v):
        num_acc[...] += jnp.sum(e_v * xn_v, axis=0, keepdims=True)   # (1, inn)
        den_acc[...] += jnp.sum(e_v)                                 # (1, 1)

    if need_mask:
        # Logical (unclamped) block id; phantom blocks past N are fully masked.
        blk = pl.program_id(0) * pl.num_programs(1) + i
        tile_end = (blk + 1) * tile_n

        @pl.when(tile_end > n_total)
        def _ragged_tile():
            row = blk * tile_n + lax.broadcasted_iota(jnp.int32, (tile_n, 1), 0)
            valid = row < n_total
            # Mask BOTH e and xn: padded rows are unspecified memory and could
            # carry NaN/Inf garbage that would poison num_acc otherwise.
            _accumulate(jnp.where(valid, e, 0.0), jnp.where(valid, xn, 0.0))

        @pl.when(tile_end <= n_total)
        def _full_tile():
            _accumulate(e, xn)
    else:
        _accumulate(e, xn)

    @pl.when(i == pl.num_programs(1) - 1)
    def _finalize():
        # Per-core partial sums; exact combine (sum + divide) happens outside.
        num_out_ref[...] = num_acc[...]
        den_out_ref[...] = den_acc[...]


def summary_forward(xo, xn, wo_col, wn_col, b, *, tile_n=4096):
    """xo: (N, ino), xn: (N, inn), wo_col: (ino, 1), wn_col: (inn, 1),
    b: (1, 1)  ->  (inn,)"""
    n, ino = xo.shape
    n2, inn = xn.shape
    assert n == n2

    # Tile over N: full array if it already fits a tile, else a sublane-aligned
    # tile large enough to amortize the ~0.35 us per-grid-step overhead while
    # keeping double-buffered tiles well under the scoped VMEM limit.
    if n <= tile_n:
        tn = n
    else:
        tn = tile_n
        assert tn % 8 == 0, "tile_n must be sublane-aligned"

    nb = pl.cdiv(n, tn)                       # number of real row-blocks
    num_chunks = 2 if nb >= 2 else 1          # shard reduction over v7x's 2 TCs
    steps = pl.cdiv(nb, num_chunks)           # row-blocks per core chunk
    need_mask = (n % tn != 0) or (num_chunks * steps != nb)

    kernel = functools.partial(summary_kernel, n_total=n, tile_n=tn,
                               need_mask=need_mask)

    def row_block(c, i):
        # Clamp phantom trailing blocks (fully masked in-kernel) onto the last
        # real block so the auto-DMA never reads out of bounds.
        return (jnp.minimum(c * steps + i, nb - 1), 0)

    num_part, den_part = pl.pallas_call(
        kernel,
        out_shape=(
            jax.ShapeDtypeStruct((num_chunks, 1, inn), jnp.float32),
            jax.ShapeDtypeStruct((num_chunks, 1, 1), jnp.float32),
        ),
        grid=(num_chunks, steps),
        in_specs=[
            pl.BlockSpec((tn, ino), row_block),                    # xo tile
            pl.BlockSpec((tn, inn), row_block),                    # xn tile
            pl.BlockSpec((ino, 1), lambda c, i: (0, 0)),           # wo column
            pl.BlockSpec((inn, 1), lambda c, i: (0, 0)),           # wn column
            pl.BlockSpec(memory_space=pltpu.MemorySpace.SMEM),     # bias scalar
        ],
        out_specs=(
            pl.BlockSpec((None, 1, inn), lambda c, i: (c, 0, 0)),  # num partial
            pl.BlockSpec((None, 1, 1), lambda c, i: (c, 0, 0)),    # den partial
        ),
        scratch_shapes=[
            pltpu.VMEM((1, inn), jnp.float32),   # streaming numerator (f32)
            pltpu.VMEM((1, 1), jnp.float32),     # streaming denominator (f32)
        ],
        compiler_params=pltpu.CompilerParams(
            dimension_semantics=("parallel", "arbitrary"),
            vmem_limit_bytes=32 * 1024 * 1024,   # safe on v5e/v6e/v7x
        ),
    )(xo, xn, wo_col, wn_col, b)

    # Exact combine (once per call): sum per-core partials, then divide.
    num = num_part.sum(axis=(0, 1))            # (inn,), f32
    den = den_part.sum()                       # scalar, f32
    return (num / den).astype(xn.dtype)


def reference_forward(xo, xn, wo_col, wn_col, b):
    m = (xo @ wo_col + xn @ wn_col).reshape(-1) + b[0, 0]   # (N,)
    m = jnp.tanh(m)
    m = jnp.exp(m) / jnp.exp(m).sum()
    return m @ xn


if __name__ == "__main__":
    key = jax.random.PRNGKey(0)
    k_xo, k_xn, k_w, k_b = jax.random.split(key, 4)

    # Small but non-trivial shapes: N nodes not a multiple of the tile (ragged
    # tail + phantom-block clamp exercised), lane-dense feature dims, and a
    # small tile so the 2-chunk grid / streaming accumulation actually runs.
    N, ino, inn = 200, 64, 128
    tile_n = 64

    xo = jax.random.normal(k_xo, (N, ino), dtype=jnp.float32)
    xn = jax.random.normal(k_xn, (N, inn), dtype=jnp.float32)

    # Deterministic nn.Linear(ino+inn, 1)-style init: U(-1/sqrt(fan_in), +).
    fan_in = ino + inn
    bound = 1.0 / (fan_in ** 0.5)
    w_full = jax.random.uniform(k_w, (fan_in, 1), minval=-bound, maxval=bound,
                                dtype=jnp.float32)
    wo_col = w_full[:ino]        # (ino, 1)
    wn_col = w_full[ino:]        # (inn, 1)
    b = jax.random.uniform(k_b, (1, 1), minval=-bound, maxval=bound,
                           dtype=jnp.float32)

    out = summary_forward(xo, xn, wo_col, wn_col, b, tile_n=tile_n)
    jax.block_until_ready(out)

    ref = reference_forward(xo, xn, wo_col, wn_col, b)
    assert out.shape == (inn,)
    # Exact (non-approx) finalize: tight tolerance again.
    assert jnp.allclose(out, ref, atol=1e-4, rtol=1e-4), "mismatch vs reference"

    print("KERNEL_OK")
</pallas_src>

<mosaic_0001>
module attributes {stable_mosaic.version = 11 : i64} {
  func.func @summary_kernel(%arg0: i32, %arg1: i32, %arg2: memref<64x64xf32, #tpu.memory_space<vmem>>, %arg3: memref<64x128xf32, #tpu.memory_space<vmem>>, %arg4: memref<64x1xf32, #tpu.memory_space<vmem>>, %arg5: memref<128x1xf32, #tpu.memory_space<vmem>>, %arg6: memref<1x1xf32, #tpu.memory_space<smem>>, %arg7: memref<1x1x128xf32, #tpu.memory_space<vmem>>, %arg8: memref<1x1x1xf32, #tpu.memory_space<vmem>>, %arg9: memref<1x128xf32, #tpu.memory_space<vmem>>, %arg10: memref<1x1xf32, #tpu.memory_space<vmem>>) attributes {dimension_semantics = [#tpu.dimension_semantics<parallel>, #tpu.dimension_semantics<arbitrary>], iteration_bounds = array<i64: 2, 2>, scalar_prefetch = 0 : i64, scratch_operands = 2 : i64, tpu.core_type = #tpu.core_type<tc>, window_params = [{transform_indices = @transform_0, window_bounds = array<i64: 64, 64>}, {transform_indices = @transform_1, window_bounds = array<i64: 64, 128>}, {pipeline_mode = #tpu.pipeline_mode<synchronous>, transform_indices = @transform_2, window_bounds = array<i64: 64, 1>}, {pipeline_mode = #tpu.pipeline_mode<synchronous>, transform_indices = @transform_3, window_bounds = array<i64: 128, 1>}, {transform_indices = @transform_4, window_bounds = array<i64: 1, 1>}, {transform_indices = @transform_5, window_bounds = array<i64: 1, 1, 128>}, {transform_indices = @transform_6, window_bounds = array<i64: 1, 1, 1>}]} {
    %c0_i32 = arith.constant 0 : i32
    %0 = arith.cmpi eq, %arg1, %c0_i32 : i32
    %1 = arith.extui %0 : i1 to i32
    %c0_i32_0 = arith.constant 0 : i32
    %2 = arith.cmpi ne, %1, %c0_i32_0 : i32
    scf.if %2 {
      %cst_16 = arith.constant 0.000000e+00 : f32
      %28 = vector.broadcast %cst_16 : f32 to vector<1x128xf32>
      %c0_17 = arith.constant 0 : index
      %c0_18 = arith.constant 0 : index
      %29 = vector.load %arg9[%c0_17, %c0_18] : memref<1x128xf32, #tpu.memory_space<vmem>>, vector<1x128xf32>
      tpu.vector_store %arg9[%c0_17, %c0_18], %28 {strides = array<i32>} : memref<1x128xf32, #tpu.memory_space<vmem>>, vector<1x128xf32>,
      %cst_19 = arith.constant 0.000000e+00 : f32
      %30 = vector.broadcast %cst_19 : f32 to vector<1x1xf32>
      %c0_20 = arith.constant 0 : index
      %c0_21 = arith.constant 0 : index
      %31 = vector.load %arg10[%c0_20, %c0_21] : memref<1x1xf32, #tpu.memory_space<vmem>>, vector<1x1xf32>
      tpu.vector_store %arg10[%c0_20, %c0_21], %30 {strides = array<i32>} : memref<1x1xf32, #tpu.memory_space<vmem>>, vector<1x1xf32>,
    } else {
    }
    %c0 = arith.constant 0 : index
    %c0_1 = arith.constant 0 : index
    %3 = vector.load %arg2[%c0, %c0_1] : memref<64x64xf32, #tpu.memory_space<vmem>>, vector<64x64xf32>
    %c0_2 = arith.constant 0 : index
    %c0_3 = arith.constant 0 : index
    %4 = vector.load %arg3[%c0_2, %c0_3] : memref<64x128xf32, #tpu.memory_space<vmem>>, vector<64x128xf32>
    %c0_4 = arith.constant 0 : index
    %c0_5 = arith.constant 0 : index
    %5 = vector.load %arg4[%c0_4, %c0_5] : memref<64x1xf32, #tpu.memory_space<vmem>>, vector<64x1xf32>
    %c0_6 = arith.constant 0 : index
    %c0_7 = arith.constant 0 : index
    %6 = vector.load %arg5[%c0_6, %c0_7] : memref<128x1xf32, #tpu.memory_space<vmem>>, vector<128x1xf32>
    %cst = arith.constant dense<0.000000e+00> : vector<64x1xf32>
    %7 = tpu.matmul %3, %5, %cst {dimension_numbers = #tpu.dot_dimension_numbers<[1], [0], [0], [1], [0, 0, 1, 1], [], []>} : vector<64x64xf32>, vector<64x1xf32>, vector<64x1xf32> -> vector<64x1xf32>
    %cst_8 = arith.constant dense<0.000000e+00> : vector<64x1xf32>
    %8 = tpu.matmul %4, %6, %cst_8 {dimension_numbers = #tpu.dot_dimension_numbers<[1], [0], [0], [1], [0, 0, 1, 1], [], []>} : vector<64x128xf32>, vector<128x1xf32>, vector<64x1xf32> -> vector<64x1xf32>
    %9 = arith.addf %7, %8 : vector<64x1xf32>
    %c0_9 = arith.constant 0 : index
    %c0_10 = arith.constant 0 : index
    %10 = memref.load %arg6[%c0_9, %c0_10] : memref<1x1xf32, #tpu.memory_space<smem>>
    %11 = vector.broadcast %10 : f32 to vector<64x1xf32>
    %12 = arith.addf %9, %11 : vector<64x1xf32>
    %13 = math.tanh %12 : vector<64x1xf32>
    %14 = math.exp %13 : vector<64x1xf32>
    %c2_i32 = arith.constant 2 : i32
    %15 = arith.muli %arg0, %c2_i32 : i32
    %16 = arith.addi %15, %arg1 : i32
    %c1_i32 = arith.constant 1 : i32
    %17 = arith.addi %16, %c1_i32 : i32
    %c64_i32 = arith.constant 64 : i32
    %18 = arith.muli %17, %c64_i32 : i32
    %c200_i32 = arith.constant 200 : i32
    %19 = arith.cmpi sgt, %18, %c200_i32 : i32
    %20 = arith.extui %19 : i1 to i32
    %c0_i32_11 = arith.constant 0 : i32
    %21 = arith.cmpi ne, %20, %c0_i32_11 : i32
    scf.if %21 {
      %c64_i32_16 = arith.constant 64 : i32
      %28 = arith.muli %16, %c64_i32_16 : i32
      %29 = tpu.iota {dimensions = array<i32: 0>} : vector<64x1xi32>
      %30 = vector.broadcast %28 : i32 to vector<64x1xi32>
      %31 = arith.addi %30, %29 : vector<64x1xi32>
      %c200_i32_17 = arith.constant 200 : i32
      %32 = vector.broadcast %c200_i32_17 : i32 to vector<64x1xi32>
      %33 = arith.cmpi slt, %31, %32 : vector<64x1xi32>
      %cst_18 = arith.constant 0.000000e+00 : f32
      %34 = vector.broadcast %cst_18 : f32 to vector<64x1xf32>
      %35 = arith.select %33, %14, %34 : vector<64x1xi1>, vector<64x1xf32>
      %cst_19 = arith.constant 0.000000e+00 : f32
      %36 = vector.shape_cast %33 : vector<64x1xi1> to vector<64x1xi1>
      %37 = vector.broadcast %36 : vector<64x1xi1> to vector<64x128xi1>
      %38 = vector.broadcast %cst_19 : f32 to vector<64x128xf32>
      %39 = arith.select %37, %4, %38 : vector<64x128xi1>, vector<64x128xf32>
      %c0_20 = arith.constant 0 : index
      %c0_21 = arith.constant 0 : index
      %40 = vector.load %arg9[%c0_20, %c0_21] : memref<1x128xf32, #tpu.memory_space<vmem>>, vector<1x128xf32>
      %41 = vector.broadcast %35 : vector<64x1xf32> to vector<64x128xf32>
      %42 = arith.mulf %41, %39 : vector<64x128xf32>
      %cst_22 = arith.constant dense<0.000000e+00> : vector<128xf32>
      %43 = vector.multi_reduction <add>, %42, %cst_22 [0] : vector<64x128xf32> to vector<128xf32>
      %44 = vector.shape_cast %43 : vector<128xf32> to vector<1x128xf32>
      %45 = arith.addf %40, %44 : vector<1x128xf32>
      %c0_23 = arith.constant 0 : index
      %c0_24 = arith.constant 0 : index
      %46 = vector.load %arg9[%c0_23, %c0_24] : memref<1x128xf32, #tpu.memory_space<vmem>>, vector<1x128xf32>
      tpu.vector_store %arg9[%c0_23, %c0_24], %45 {strides = array<i32>} : memref<1x128xf32, #tpu.memory_space<vmem>>, vector<1x128xf32>,
      %c0_25 = arith.constant 0 : index
      %c0_26 = arith.constant 0 : index
      %47 = vector.load %arg10[%c0_25, %c0_26] : memref<1x1xf32, #tpu.memory_space<vmem>>, vector<1x1xf32>
      %48 = vector.shape_cast %35 : vector<64x1xf32> to vector<1x64x1xf32>
      %cst_27 = arith.constant dense<0.000000e+00> : vector<1xf32>
      %49 = vector.multi_reduction <add>, %48, %cst_27 [1, 2] : vector<1x64x1xf32> to vector<1xf32>
      %50 = vector.shape_cast %49 : vector<1xf32> to vector<1x1x1xf32>
      %51 = vector.extract %50[0, 0, 0] : f32 from vector<1x1x1xf32>
      %52 = vector.broadcast %51 : f32 to vector<1x1xf32>
      %53 = arith.addf %47, %52 : vector<1x1xf32>
      %c0_28 = arith.constant 0 : index
      %c0_29 = arith.constant 0 : index
      %54 = vector.load %arg10[%c0_28, %c0_29] : memref<1x1xf32, #tpu.memory_space<vmem>>, vector<1x1xf32>
      tpu.vector_store %arg10[%c0_28, %c0_29], %53 {strides = array<i32>} : memref<1x1xf32, #tpu.memory_space<vmem>>, vector<1x1xf32>,
    } else {
    }
    %c200_i32_12 = arith.constant 200 : i32
    %22 = arith.cmpi sle, %18, %c200_i32_12 : i32
    %23 = arith.extui %22 : i1 to i32
    %c0_i32_13 = arith.constant 0 : i32
    %24 = arith.cmpi ne, %23, %c0_i32_13 : i32
    scf.if %24 {
      %c0_16 = arith.constant 0 : index
      %c0_17 = arith.constant 0 : index
      %28 = vector.load %arg9[%c0_16, %c0_17] : memref<1x128xf32, #tpu.memory_space<vmem>>, vector<1x128xf32>
      %29 = vector.broadcast %14 : vector<64x1xf32> to vector<64x128xf32>
      %30 = arith.mulf %29, %4 : vector<64x128xf32>
      %cst_18 = arith.constant dense<0.000000e+00> : vector<128xf32>
      %31 = vector.multi_reduction <add>, %30, %cst_18 [0] : vector<64x128xf32> to vector<128xf32>
      %32 = vector.shape_cast %31 : vector<128xf32> to vector<1x128xf32>
      %33 = arith.addf %28, %32 : vector<1x128xf32>
      %c0_19 = arith.constant 0 : index
      %c0_20 = arith.constant 0 : index
      %34 = vector.load %arg9[%c0_19, %c0_20] : memref<1x128xf32, #tpu.memory_space<vmem>>, vector<1x128xf32>
      tpu.vector_store %arg9[%c0_19, %c0_20], %33 {strides = array<i32>} : memref<1x128xf32, #tpu.memory_space<vmem>>, vector<1x128xf32>,
      %c0_21 = arith.constant 0 : index
      %c0_22 = arith.constant 0 : index
      %35 = vector.load %arg10[%c0_21, %c0_22] : memref<1x1xf32, #tpu.memory_space<vmem>>, vector<1x1xf32>
      %36 = vector.shape_cast %14 : vector<64x1xf32> to vector<1x64x1xf32>
      %cst_23 = arith.constant dense<0.000000e+00> : vector<1xf32>
      %37 = vector.multi_reduction <add>, %36, %cst_23 [1, 2] : vector<1x64x1xf32> to vector<1xf32>
      %38 = vector.shape_cast %37 : vector<1xf32> to vector<1x1x1xf32>
      %39 = vector.extract %38[0, 0, 0] : f32 from vector<1x1x1xf32>
      %40 = vector.broadcast %39 : f32 to vector<1x1xf32>
      %41 = arith.addf %35, %40 : vector<1x1xf32>
      %c0_24 = arith.constant 0 : index
      %c0_25 = arith.constant 0 : index
      %42 = vector.load %arg10[%c0_24, %c0_25] : memref<1x1xf32, #tpu.memory_space<vmem>>, vector<1x1xf32>
      tpu.vector_store %arg10[%c0_24, %c0_25], %41 {strides = array<i32>} : memref<1x1xf32, #tpu.memory_space<vmem>>, vector<1x1xf32>,
    } else {
    }
    %c1_i32_14 = arith.constant 1 : i32
    %25 = arith.cmpi eq, %arg1, %c1_i32_14 : i32
    %26 = arith.extui %25 : i1 to i32
    %c0_i32_15 = arith.constant 0 : i32
    %27 = arith.cmpi ne, %26, %c0_i32_15 : i32
    scf.if %27 {
      %c0_16 = arith.constant 0 : index
      %c0_17 = arith.constant 0 : index
      %28 = vector.load %arg9[%c0_16, %c0_17] : memref<1x128xf32, #tpu.memory_space<vmem>>, vector<1x128xf32>
      %c0_18 = arith.constant 0 : index
      %c0_19 = arith.constant 0 : index
      %c0_20 = arith.constant 0 : index
      %29 = vector.load %arg7[%c0_18, %c0_19, %c0_20] : memref<1x1x128xf32, #tpu.memory_space<vmem>>, vector<1x1x128xf32>
      %30 = vector.shape_cast %29 : vector<1x1x128xf32> to vector<1x128xf32>
      %31 = vector.shape_cast %28 : vector<1x128xf32> to vector<1x1x128xf32>
      tpu.vector_store %arg7[%c0_18, %c0_19, %c0_20], %31 {strides = array<i32>} : memref<1x1x128xf32, #tpu.memory_space<vmem>>, vector<1x1x128xf32>,
      %c0_21 = arith.constant 0 : index
      %c0_22 = arith.constant 0 : index
      %32 = vector.load %arg10[%c0_21, %c0_22] : memref<1x1xf32, #tpu.memory_space<vmem>>, vector<1x1xf32>
      %c0_23 = arith.constant 0 : index
      %c0_24 = arith.constant 0 : index
      %c0_25 = arith.constant 0 : index
      %33 = vector.load %arg8[%c0_23, %c0_24, %c0_25] : memref<1x1x1xf32, #tpu.memory_space<vmem>>, vector<1x1x1xf32>
      %34 = vector.shape_cast %33 : vector<1x1x1xf32> to vector<1x1xf32>
      %35 = vector.shape_cast %32 : vector<1x1xf32> to vector<1x1x1xf32>
      tpu.vector_store %arg8[%c0_23, %c0_24, %c0_25], %35 {strides = array<i32>} : memref<1x1x1xf32, #tpu.memory_space<vmem>>, vector<1x1x1xf32>,
    } else {
    }
    return
  }
  func.func @transform_0(%arg0: i32, %arg1: i32) -> (i32, i32) {
    %c2_i32 = arith.constant 2 : i32
    %0 = arith.muli %arg0, %c2_i32 : i32
    %1 = arith.addi %0, %arg1 : i32
    %c3_i32 = arith.constant 3 : i32
    %2 = arith.minsi %1, %c3_i32 : i32
    %c0_i32 = arith.constant 0 : i32
    %c0_i32_0 = arith.constant 0 : i32
    return %2, %c0_i32 : i32, i32
  }
  func.func @transform_1(%arg0: i32, %arg1: i32) -> (i32, i32) {
    %c2_i32 = arith.constant 2 : i32
    %0 = arith.muli %arg0, %c2_i32 : i32
    %1 = arith.addi %0, %arg1 : i32
    %c3_i32 = arith.constant 3 : i32
    %2 = arith.minsi %1, %c3_i32 : i32
    %c0_i32 = arith.constant 0 : i32
    %c0_i32_0 = arith.constant 0 : i32
    return %2, %c0_i32 : i32, i32
  }
  func.func @transform_2(%arg0: i32, %arg1: i32) -> (i32, i32) {
    %c0_i32 = arith.constant 0 : i32
    %c0_i32_0 = arith.constant 0 : i32
    %c0_i32_1 = arith.constant 0 : i32
    return %c0_i32, %c0_i32_0 : i32, i32
  }
  func.func @transform_3(%arg0: i32, %arg1: i32) -> (i32, i32) {
    %c0_i32 = arith.constant 0 : i32
    %c0_i32_0 = arith.constant 0 : i32
    %c0_i32_1 = arith.constant 0 : i32
    return %c0_i32, %c0_i32_0 : i32, i32
  }
  func.func @transform_4(%arg0: i32, %arg1: i32) -> (i32, i32) {
    %c0_i32 = arith.constant 0 : i32
    %c0_i32_0 = arith.constant 0 : i32
    %c0_i32_1 = arith.constant 0 : i32
    return %c0_i32, %c0_i32_0 : i32, i32
  }
  func.func @transform_5(%arg0: i32, %arg1: i32) -> (i32, i32, i32) {
    %c0_i32 = arith.constant 0 : i32
    %c0_i32_0 = arith.constant 0 : i32
    %c0_i32_1 = arith.constant 0 : i32
    return %arg0, %c0_i32, %c0_i32_0 : i32, i32, i32
  }
  func.func @transform_6(%arg0: i32, %arg1: i32) -> (i32, i32, i32) {
    %c0_i32 = arith.constant 0 : i32
    %c0_i32_0 = arith.constant 0 : i32
    %c0_i32_1 = arith.constant 0 : i32
    return %arg0, %c0_i32, %c0_i32_0 : i32, i32, i32
  }
}

</mosaic_0001>

<bundles_post_ra>
// kernel: tpu_custom_call.1
= control target key start
LH: loop header
LB: loop body
LE: loop exit
PB: predicated region body
PF: predicated region fallthrough
CT: control target
= control target key end

     0   :  { %s1938_s0 = inlined_call_operand.vmem [shape: f32[200,64], index: 0, kind: input, shape index: {}]   ;;  %s1939_s1 = inlined_call_operand.vmem [shape: f32[200,128], index: 1, kind: input, shape index: {}]   ;;  %s1940_s2 = inlined_call_operand.vmem [shape: f32[64,1], index: 2, kind: input, shape index: {}]   ;;  %s1941_s3 = inlined_call_operand.vmem [shape: f32[128,1], index: 3, kind: input, shape index: {}]   ;;  %s1942_s4 = inlined_call_operand.<no memory space> [shape: f32[1,1], index: 4, kind: input, shape index: {}]   ;;  %s1943_s5 = inlined_call_operand.hbm [shape: f32[2,1,128], index: 5, kind: output, shape index: {0}]   ;;  %s1944_s6 = inlined_call_operand.vmem [shape: f32[2,1,1], index: 6, kind: output, shape index: {1}]  }
   0x1   :  { %12 = sst [smem:[#allocation4]] %s1942_s4 }
   0x2   :  { %13 = vsyncpa [#allocation6], 0 }
   0x3   :  { %15 = vsyncpa [#allocation6 + $0x1], 0  ;;  %s1546_s23 = smov 0   ;;  %s1548_s24 = smov 0  }
   0x4   :  { %s1550_s25 = smov 0   ;;  %s1552_s26 = smov 0  }
   0x5   :  { %s1554_s27 = smov 0   ;;  %s1556_s28 = smov 0  }
   0x6   :  { %s1558_s29 = smov 0   ;;  %s1560_s30 = smov 0  }
   0x7 LB: > { %1948 = sst [smem:[#allocation8_spill]] %s1494_s28  ;;  %s1091_s4 = sadd.s32 4294967295, %s1502_s30   ;;  %s1502_s30 = sphi %s1560_s30, %s21_s30   ;;  %s1498_s29 = sphi %s1558_s29, %s1959_s29   ;;  %s1494_s28 = sphi %s1556_s28, %s1958_s28   ;;  %s1490_s27 = sphi %s1554_s27, %s1957_s27   ;;  %s1486_s26 = sphi %s1552_s26, %s1956_s26   ;;  %s1482_s25 = sphi %s1550_s25, %s1962_s25   ;;  %s1478_s24 = sphi %s1548_s24, %s1961_s24   ;;  %s1474_s23 = sphi %s1546_s23, %s1960_s23  }
   0x8   : > { %1949 = sst [smem:[#allocation9_spill]] %s1498_s29  ;;  %s1092_s7 = sadd.s32 4294967294, %s1502_s30  }
   0x9   : > { %s30_s8 = sadd.s32 1, %s1494_s28  ;;  %s33_s9 = sadd.s32 1, %s1498_s29 }
   0xa   : > { %p31_p0 = scmp.ge.s32.totalorder %s30_s8, 2  ;;  %p181_p1 = scmp.ne.s32.totalorder %s1482_s25, %s1478_s24 }
   0xb   : > { %p182_p2 = scmp.eq.s32.totalorder %s1091_s4, 3  ;;  %p187_p4 = scmp.ne.s32.totalorder %s1478_s24, %s1474_s23 }
   0xc   : > { %s1964_s8 = smov (%p31_p0, %s30_s8), 0  ;;  %s1966_s9 = smov (!%p31_p0, %s33_s9), %s1498_s29 }
   0xd   : > { %1950 = sst [smem:[#allocation10_spill]] %s1964_s8  ;;  %p1595_p3 = por %p182_p2, %p181_p1 }
   0xe   : > { %p35_p5 = scmp.ge.s32.totalorder %s1966_s9, 2  ;;  %p188_p6 = scmp.eq.s32.totalorder %s1092_s7, 3 }
   0xf   : > { %p1099_p7 = scmp.ge.s32.totalorder %s1502_s30, 1  ;;  %p291_p8 = scmp.lt.s32.totalorder %s1502_s30, 5 }
  0x10   : > { %s1968_s9 = smov (%p35_p5, %s1966_s9), 0  ;;  %p1605_p9 = por %p188_p6, %p187_p4 }
  0x11   : > { %1952 = sst [smem:[#allocation11_spill]] %s1968_s9  ;;  %p292_p10 = pnand %p1099_p7, %p291_p8 }
  0x12   : > { %s168_s12 = ssub.s32 %s1498_s29, %s1968_s9  ;;  %s171_s13 = sadd.s32 1, %s1482_s25 }
  0x13   : > { %p169_p11 = scmp.eq.s32.totalorder %s168_s12, 0  ;;  %295 = sbr.rel (%p292_p10) target bundleno = 798 (0x31e), region = 40 }
  0x14   : > { %s1100_s16 = sshll.u32 (!%p292_p10), %s1490_s27, 1  ;;  %p388_p13 = scmp.lt.s32.totalorder (!%p292_p10), %s1490_s27, 1 }
  0x15   : > { %s1613_s14 = scalar_select %p169_p11, %s1482_s25, %s171_s13  }
  0x16   : > { %s1618_s17 = sadd.s32 (!%p292_p10), %s1486_s26, %s1100_s16  ;;  %s1954_s29 = sand.u32 (!%p292_p10), 1, %s1478_s24  }
  0x17   : > { %p346_p12 = scmp.lt.s32.totalorder (!%p292_p10), %s1618_s17, 3  ;;  %s1642_s28 = scalar_lea.vmem (!%p292_p10), [#allocation5], %s1954_s29 }
  0x18   : > { %p1106_p1 = scmp.ne.s32.totalorder (!%p292_p10), %s1486_s26, 0 }
  0x1a   : > { %s347_s18 = scalar_select %p346_p12, %s1618_s17, 3 }
  0x1b   : > { %s1624_s19 = scalar_select %p388_p13, %s1490_s27, 1 }
  0x1c   : > { %s1101_s20 = sshll.u32 %s347_s18, 3  ;;  %394 = sbr.rel (%p1106_p1) target bundleno = 35 (0x23), region = 44  ;;  %vm396_vm0 = vcmask (!%p1106_p1), 0   ;;  %v1504_v0 = vmov (!%p1106_p1), 0.0  }
  0x1d   : > { %p353_p0 = scmp.lt.s32.totalorder %s1101_s20, 24  ;;  %s390_s4 = scalar_lea.vmem %s1944_s6, %s1624_s19  ;;  %395 = vst [vmem:[#allocation2] sm:$0x1] (!%p1106_p1), %v1504_v0  ;;  %397 = vst.msk [vmem:[#allocation3] sm:$0x1] (!%p1106_p1), %vm396_vm0, %v1504_v0 }
  0x1f   : > { %s1970_s20 = smov (!%p353_p0, %s1101_s20), 24 }
  0x20   : > { %s1102_s7 = sshll.u32 %s1970_s20, 3 }
  0x21   : > { %s1633_s16 = scalar_lea.vmem %s1938_s0, %s1102_s7  ;;  %s1638_s8 = scalar_lea.vmem %s1939_s1, %s1102_s7 }
  0x23 PF: > { %v422_v1 = vld [vmem:[%s1941_s3] sm:$0xff]  ;;  %v423_v2 = vld [vmem:[%s1941_s3 + $0x8] sm:$0xff]  ;;  %v424_v3 = vld [vmem:[%s1941_s3 + $0x10] sm:$0xff]  ;;  %vm543_vm1 = vcmask 523264   ;;  %s673_s13 = sld [smem:[#allocation4]] }
  0x24   : > { %v1238_v4 = vpack.c.bf16 %v423_v2, %v422_v1  ;;  %v425_v5 = vld [vmem:[%s1941_s3 + $0x18] sm:$0xff]  ;;  %v426_v7 = vld [vmem:[%s1941_s3 + $0x20] sm:$0xff]  ;;  %v427_v8 = vld [vmem:[%s1941_s3 + $0x28] sm:$0xff] }
  0x25   : > { %v1242_v6 = vpack.c.bf16 %v425_v5, %v424_v3  ;;  %v414_v9 = vld [vmem:[%s1940_s2] sm:$0xff]  ;;  %v415_v10 = vld [vmem:[%s1940_s2 + $0x8] sm:$0xff]  ;;  %v416_v12 = vld [vmem:[%s1940_s2 + $0x10] sm:$0xff]  ;;  %v1246_v14 = vpack.c.bf16 %v427_v8, %v426_v7 }
  0x26   : > { %1239 = vmatprep.subr.bf16.mxu1 %v1238_v4  ;;  %v1270_v11 = vpack.c.bf16 %v415_v10, %v414_v9  ;;  %v417_v13 = vld [vmem:[%s1940_s2 + $0x18] sm:$0xff]  ;;  %v418_v16 = vld [vmem:[%s1940_s2 + $0x20] sm:$0xff]  ;;  %v419_v17 = vld [vmem:[%s1940_s2 + $0x28] sm:$0xff] }
  0x27   : > { %1241 = vmatpush3.bf16.msra.mxu1 %v1238_v4  ;;  %v1274_v15 = vpack.c.bf16 %v417_v13, %v416_v12  ;;  %v428_v18 = vld [vmem:[%s1941_s3 + $0x30] sm:$0xff]  ;;  %v429_v19 = vld [vmem:[%s1941_s3 + $0x38] sm:$0xff]  ;;  %v1278_v20 = vpack.c.bf16 %v419_v17, %v418_v16  ;;  %v398_v21 = vld [vmem:[%s1633_s16] sm:$0xff] }
  0x28   : > { %1243 = vmatprep.subr.bf16.mxu1 %v1242_v6  ;;  %1271 = vmatprep.subr.bf16.mxu0 %v1270_v11  ;;  %v1689_v22 = vld [vmem:[%s1638_s8] sm:$0xff]  ;;  %v1250_v23 = vpack.c.bf16 %v429_v19, %v428_v18  ;;  %v420_v24 = vld [vmem:[%s1940_s2 + $0x30] sm:$0xff]  ;;  %v421_v25 = vld [vmem:[%s1940_s2 + $0x38] sm:$0xff] }
  0x29   : > { %1273 = vmatpush3.bf16.msra.mxu0 %v1270_v11  ;;  %1226 = vmatprep.mubr.msk.f32.mxu0 %vm543_vm1, %v398_v21  ;;  %v430_v26 = vld [vmem:[%s1941_s3 + $0x40] sm:$0xff]  ;;  %v431_v27 = vld [vmem:[%s1941_s3 + $0x48] sm:$0xff]  ;;  %v1282_v28 = vpack.c.bf16 %v421_v25, %v420_v24  ;;  %v432_v30 = vld [vmem:[%s1941_s3 + $0x50] sm:$0xff]  ;;  %v674_v61 = vstv %s673_s13 }
  0x2a   : > { %1275 = vmatprep.subr.bf16.mxu0 %v1274_v15  ;;  %1198 = vmatprep.mubr.f32.mxu1 %v1689_v22  ;;  %v1254_v29 = vpack.c.bf16 %v431_v27, %v430_v26  ;;  %v433_v31 = vld [vmem:[%s1941_s3 + $0x58] sm:$0xff]  ;;  %v434_v33 = vld [vmem:[%s1941_s3 + $0x60] sm:$0xff]  ;;  %v435_v34 = vld [vmem:[%s1941_s3 + $0x68] sm:$0xff] }
  0x2b   : > { %1245 = vmatpush3.bf16.msra.mxu1 %v1242_v6  ;;  %v1258_v32 = vpack.c.bf16 %v433_v31, %v432_v30  ;;  %v399_v35 = vld [vmem:[%s1633_s16 + $0x8] sm:$0xff]  ;;  %v400_v36 = vld [vmem:[%s1633_s16 + $0x10] sm:$0xff]  ;;  %v1262_v37 = vpack.c.bf16 %v435_v34, %v434_v33  ;;  %v437_v39 = vld [vmem:[%s1941_s3 + $0x78] sm:$0xff] }
  0x2c   : > { %1247 = vmatprep.subr.bf16.mxu1 %v1246_v14  ;;  %v436_v38 = vld [vmem:[%s1941_s3 + $0x70] sm:$0xff]  ;;  %v401_v40 = vld [vmem:[%s1633_s16 + $0x18] sm:$0xff]  ;;  %v402_v41 = vld [vmem:[%s1633_s16 + $0x20] sm:$0xff] }
  0x2d   : > { %1277 = vmatpush3.bf16.msra.mxu0 %v1274_v15  ;;  %v1266_v42 = vpack.c.bf16 %v437_v39, %v436_v38  ;;  %v403_v43 = vld [vmem:[%s1633_s16 + $0x28] sm:$0xff]  ;;  %v404_v44 = vld [vmem:[%s1633_s16 + $0x30] sm:$0xff]  ;;  %v405_v45 = vld [vmem:[%s1633_s16 + $0x38] sm:$0xff]  ;;  %s1124_s16 = sshll.u32 %s1618_s17, 6 }
  0x2e   : > { %1279 = vmatprep.subr.bf16.mxu0 %v1278_v20  ;;  %v1737_v46 = vld [vmem:[%s1638_s8 + $0x8] sm:$0xff]  ;;  %v1740_v47 = vld [vmem:[%s1638_s8 + $0x10] sm:$0xff]  ;;  %v1746_v48 = vld [vmem:[%s1638_s8 + $0x18] sm:$0xff]  ;;  %s1768_s12 = sadd.s32 64, %s1124_s16 }
  0x2f   : > { %1249 = vmatpush3.bf16.msra.mxu1 %v1246_v14  ;;  %v1749_v49 = vld [vmem:[%s1638_s8 + $0x20] sm:$0xff]  ;;  %v1754_v50 = vld [vmem:[%s1638_s8 + $0x28] sm:$0xff]  ;;  %v1757_v51 = vld [vmem:[%s1638_s8 + $0x30] sm:$0xff]  ;;  %p1117_p2 = scmp.le.s32.totalorder %s1768_s12, 200 }
  0x30   : > { %1251 = vmatprep.subr.bf16.mxu1 %v1250_v23  ;;  %v1762_v52 = vld [vmem:[%s1638_s8 + $0x38] sm:$0xff]  ;;  %vm839_vm3 = vcmask (!%p1117_p2), 7168   ;;  %vm866_vm11 = vcmask (!%p1117_p2), 0  }
  0x31   : > { %1281 = vmatpush3.bf16.msra.mxu0 %v1278_v20 }
  0x32   : > { %1283 = vmatprep.subr.bf16.mxu0 %v1282_v28 }
  0x33   : > { %1253 = vmatpush3.bf16.msra.mxu1 %v1250_v23 }
  0x34   : > { %1255 = vmatprep.subr.bf16.mxu1 %v1254_v29 }
  0x35   : > { %1285 = vmatpush3.bf16.msra.mxu0 %v1282_v28 }
  0x37   : > { %1257 = vmatpush3.bf16.msra.mxu1 %v1254_v29 }
  0x38   : > { %1259 = vmatprep.subr.bf16.mxu1 %v1258_v32  ;;  %1227 = vmatmul.mubr.msk.f32.vlgmr.msra.gmra.mrb[0].mxu0 %vm543_vm1, %v399_v35 }
  0x39   : > { %1229 = vmatprep.mubr.msk.f32.mxu0 %vm543_vm1, %v400_v36 }
  0x3b   : > { %1261 = vmatpush3.bf16.msra.mxu1 %v1258_v32 }
  0x3c   : > { %1263 = vmatprep.subr.bf16.mxu1 %v1262_v37  ;;  %1230 = vmatmul.mubr.msk.f32.gmra.mrb[2].mxu0 %vm543_vm1, %v401_v40 }
  0x3d   : > { %1232 = vmatprep.mubr.msk.f32.mxu0 %vm543_vm1, %v402_v41 }
  0x3f   : > { %1265 = vmatpush3.bf16.msra.mxu1 %v1262_v37 }
  0x40   : > { %1267 = vmatprep.subr.bf16.mxu1 %v1266_v42  ;;  %1233 = vmatmul.mubr.msk.f32.gmra.mrb[4].mxu0 %vm543_vm1, %v403_v43 }
  0x41   : > { %1235 = vmatprep.mubr.msk.f32.mxu0 %vm543_vm1, %v404_v44 }
  0x43   : > { %1269 = vmatpush3.bf16.msra.mxu1 %v1266_v42 }
  0x44   : > { %1236 = vmatmul.mubr.msk.f32.gmra.mrb[6].mxu0 %vm543_vm1, %v405_v45 }
  0x46   : > { %1199 = vmatmul.mubr.f32.vlgmr.msra.gmra.mrb[0].mxu1 %v1737_v46 }
  0x47   : > { %1201 = vmatprep.mubr.f32.mxu1 %v1740_v47 }
  0x4a   : > { %1202 = vmatmul.mubr.f32.gmra.mrb[2].mxu1 %v1746_v48 }
  0x4b   : > { %1204 = vmatprep.mubr.f32.mxu1 %v1749_v49 }
  0x4e   : > { %1205 = vmatmul.mubr.f32.gmra.mrb[4].mxu1 %v1754_v50 }
  0x4f   : > { %1207 = vmatprep.mubr.f32.mxu1 %v1757_v51 }
  0x52   : > { %1208 = vmatmul.mubr.f32.gmra.mrb[6].mxu1 %v1762_v52 }
 0x10b   : > { %v1228_v53 = vpop.f32.mrb[0].mxu0 }
 0x10c   : > { %v634_v54 = vpop.f32.mrb[1].mxu0 }
 0x10f   : > { %v1231_v55 = vpop.f32.mrb[2].mxu0 }
 0x110   : > { %v644_v56 = vpop.f32.mrb[3].mxu0 }
 0x113   : > { %v1234_v57 = vpop.f32.mrb[4].mxu0 }
 0x114   : > { %v654_v58 = vpop.f32.mrb[5].mxu0 }
 0x117   : > { %v1237_v59 = vpop.f32.mrb[6].mxu0 }
 0x118   : > { %v664_v62 = vpop.f32.mrb[7].mxu0 }
 0x119   : > { %v1200_v60 = vpop.f32.mrb[0].mxu1 }
 0x11a   : > { %v640_v63 = vadd.f32 %v1228_v53, %v1200_v60  ;;  %v504_v0 = vpop.f32.mrb[1].mxu1 }
 0x11b   : > { %v635_v1 = vadd.f32 %v634_v54, %v504_v0  ;;  %v716_v54 = vlaneseq (!%p1117_p2) }
 0x11c   : > { %v676_v2 = vadd.f32 %v674_v61, %v640_v63 }
 0x11d   : > { %v675_v3 = vadd.f32 %v674_v61, %v635_v1  ;;  %v1203_v4 = vpop.f32.mrb[2].mxu1 }
 0x11e   : > { %1372 = vtanh.f32 %v676_v2  ;;  %v650_v5 = vadd.f32 %v1231_v55, %v1203_v4  ;;  %v514_v6 = vpop.f32.mrb[3].mxu1  ;;  %v1505_v55 = vmov (!%p1117_p2), 0  }
 0x11f   : > { %1374 = vtanh.f32 %v675_v3  ;;  %v645_v7 = vadd.f32 %v644_v56, %v514_v6  ;;  %1405 = vset.pattern.permute.xlu1 (!%p1117_p2), %v1505_v55  ;;  %1404 = vset.pattern.permute.xlu0 (!%p1117_p2), %v1505_v55  ;;  %v717_v56 = vshrl.u32 (!%p1117_p2), %v716_v54, 7 }
 0x120   : > { %v678_v8 = vadd.f32 %v674_v61, %v650_v5 }
 0x121   : > { %v677_v9 = vadd.f32 %v674_v61, %v645_v7  ;;  %v1206_v10 = vpop.f32.mrb[4].mxu1  ;;  %v720_v60 = vadd.s32 (!%p1117_p2), 24, %v717_v56  ;;  %v723_v63 = vadd.s32 (!%p1117_p2), 48, %v717_v56  ;;  %v724_v5 = vadd.s32 (!%p1117_p2), 56, %v717_v56 }
 0x122   : > { %1376 = vtanh.f32 %v678_v8  ;;  %v660_v11 = vadd.f32 %v1234_v57, %v1206_v10  ;;  %v524_v12 = vpop.f32.mrb[5].mxu1  ;;  %v725_v57 = vstv (!%p1117_p2), %s1124_s16 }
 0x123   : > { %1378 = vtanh.f32 %v677_v9  ;;  %v655_v13 = vadd.f32 %v654_v58, %v524_v12  ;;  %v718_v58 = vadd.s32 (!%p1117_p2), 8, %v717_v56  ;;  %v726_v0 = vadd.s32 (!%p1117_p2), %v725_v57, %v717_v56 }
 0x124   : > { %v680_v14 = vadd.f32 %v674_v61, %v660_v11  ;;  %v729_v3 = vadd.s32 (!%p1117_p2), %v725_v57, %v720_v60  ;;  %v1795_v8 = vadd.s32 (!%p1117_p2), %v725_v57, %v723_v63 }
 0x125   : > { %v679_v15 = vadd.f32 %v674_v61, %v655_v13  ;;  %v1209_v16 = vpop.f32.mrb[6].mxu1  ;;  %v727_v1 = vadd.s32 (!%p1117_p2), %v725_v57, %v718_v58  ;;  %vm734_vm2 = vcmp.lt.s32.totalorder (!%p1117_p2), %v726_v0, 200  ;;  %v733_v13 = vadd.s32 (!%p1117_p2), %v725_v57, %v724_v5 }
 0x126   : > { %1380 = vtanh.f32 %v680_v14  ;;  %v670_v17 = vadd.f32 %v1237_v59, %v1209_v16  ;;  %v534_v18 = vpop.f32.mrb[7].mxu1  ;;  %v719_v59 = vadd.s32 (!%p1117_p2), 16, %v717_v56  ;;  %vm737_vm6 = vcmp.lt.s32.totalorder (!%p1117_p2), %v729_v3, 200 }
 0x127   : > { %1382 = vtanh.f32 %v679_v15  ;;  %v665_v19 = vadd.f32 %v664_v62, %v534_v18  ;;  %v722_v62 = vadd.s32 (!%p1117_p2), 40, %v717_v56  ;;  %vm735_vm4 = vcmp.lt.s32.totalorder (!%p1117_p2), %v727_v1, 200 }
 0x128   : > { %v1373_v20 = vpop.eup %1372  ;;  %v682_v21 = vadd.f32 %v674_v61, %v670_v17  ;;  %v728_v2 = vadd.s32 (!%p1117_p2), %v725_v57, %v719_v59  ;;  %vm740_vm9 = vcmp.lt.s32.totalorder (!%p1117_p2), %v1795_v8, 200  ;;  %vm741_vm10 = vcmp.lt.s32.totalorder (!%p1117_p2), %v733_v13, 200 }
 0x129   : > { %v1375_v23 = vpop.eup %1374  ;;  %v693_v24 = vmul.f32 1.442695, %v1373_v20  ;;  %v681_v25 = vadd.f32 %v674_v61, %v665_v19  ;;  %v721_v61 = vadd.s32 (!%p1117_p2), 32, %v717_v56  ;;  %v1791_v6 = vadd.s32 (!%p1117_p2), %v725_v57, %v722_v62 }
 0x12a   : > { %v691_v26 = vmul.f32 1.442695, %v1375_v23  ;;  %1384 = vtanh.f32 %v682_v21  ;;  %vm736_vm5 = vcmp.lt.s32.totalorder (!%p1117_p2), %v728_v2, 200  ;;  %v767_v55 = vsel (!%p1117_p2), %vm735_vm4, %v1737_v46, 0.0 }
 0x12b   : > { %1386 = vpow2.f32 %v693_v24  ;;  %v1789_v4 = vadd.s32 (!%p1117_p2), %v725_v57, %v721_v61  ;;  %vm739_vm8 = vcmp.lt.s32.totalorder (!%p1117_p2), %v1791_v6, 200  ;;  %v768_v58 = vsel (!%p1117_p2), %vm736_vm5, %v1740_v47, 0.0 }
 0x12c   : > { %v1377_v27 = vpop.eup %1376  ;;  %1388 = vpow2.f32 %v691_v26  ;;  %v766_v59 = vsel (!%p1117_p2), %vm734_vm2, %v1689_v22, 0.0  ;;  %v769_v62 = vsel (!%p1117_p2), %vm737_vm6, %v1746_v48, 0.0  ;;  %v771_v0 = vsel (!%p1117_p2), %vm739_vm8, %v1754_v50, 0.0 }
 0x12d   : > { %v1379_v28 = vpop.eup %1378  ;;  %v697_v29 = vmul.f32 1.442695, %v1377_v27  ;;  %1390 = vtanh.f32 %v681_v25  ;;  %vm738_vm7 = vcmp.lt.s32.totalorder (!%p1117_p2), %v1789_v4, 200  ;;  %v772_v3 = vsel (!%p1117_p2), %vm740_vm9, %v1757_v51, 0.0 }
 0x12e   : > { %v695_v30 = vmul.f32 1.442695, %v1379_v28  ;;  %v770_v1 = vsel (!%p1117_p2), %vm738_vm7, %v1749_v49, 0.0  ;;  %v773_v4 = vsel (!%p1117_p2), %vm741_vm10, %v1762_v52, 0.0 }
 0x12f   : > { %1392 = vpow2.f32 %v697_v29 }
 0x130   : > { %v1381_v31 = vpop.eup %1380  ;;  %1394 = vpow2.f32 %v695_v30 }
 0x131   : > { %v1383_v32 = vpop.eup %1382  ;;  %v701_v33 = vmul.f32 1.442695, %v1381_v31 }
 0x132   : > { %v699_v34 = vmul.f32 1.442695, %v1383_v32 }
 0x133   : > { %1396 = vpow2.f32 %v701_v33 }
 0x134   : > { %v1385_v35 = vpop.eup %1384  ;;  %1398 = vpow2.f32 %v699_v34 }
 0x135   : > { %v1770_v36 = vpop.eup %1386  ;;  %v705_v37 = vmul.f32 1.442695, %v1385_v35 }
 0x136   : > { %v1772_v38 = vpop.eup %1388  ;;  %v743_v9 = vsel (!%p1117_p2), %vm735_vm4, %v1770_v36, 0.0 }
 0x137   : > { %v1391_v39 = vpop.eup %1390  ;;  %1400 = vpow2.f32 %v705_v37  ;;  %v742_v7 = vsel (!%p1117_p2), %vm734_vm2, %v1772_v38, 0.0  ;;  %782 = vperm.xlu1 (!%p1117_p2), %1405, %v743_v9   ;;  %v841_v14 = vsel (!%p1117_p2), %vm839_vm3, %v743_v9, 0.0 }
 0x138   : > { %v703_v40 = vmul.f32 1.442695, %v1391_v39  ;;  %v840_v12 = vsel (!%p1117_p2), %vm839_vm3, %v742_v7, 0.0 }
 0x139   : > { %v1774_v41 = vpop.eup %1392  ;;  %v842_v17 = vadd.f32 (!%p1117_p2), %v841_v14, %v840_v12 }
 0x13a   : > { %v1776_v42 = vpop.eup %1394  ;;  %1402 = vpow2.f32 %v703_v40  ;;  %v745_v11 = vsel (!%p1117_p2), %vm737_vm6, %v1774_v41, 0.0 }
 0x13b   : > { %v744_v10 = vsel (!%p1117_p2), %vm736_vm5, %v1776_v42, 0.0  ;;  %v845_v18 = vsel (!%p1117_p2), %vm839_vm3, %v745_v11, 0.0 }
 0x13c   : > { %v843_v15 = vsel (!%p1117_p2), %vm839_vm3, %v744_v10, 0.0  ;;  %787 = vperm.xlu1 (!%p1117_p2), %1405, %v744_v10  }
 0x13d   : > { %v1778_v43 = vpop.eup %1396  ;;  %v844_v20 = vadd.f32 (!%p1117_p2), %v843_v15, %v842_v17 }
 0x13e   : > { %v1780_v44 = vpop.eup %1398  ;;  %714 = sbr.rel (%p1117_p2) target bundleno = 539 (0x21b), region = 48  ;;  %v747_v19 = vsel (!%p1117_p2), %vm739_vm8, %v1778_v43, 0.0 }
 0x13f   : > { %v746_v16 = vsel (!%p1117_p2), %vm738_vm7, %v1780_v44, 0.0  ;;  %v846_v24 = vadd.f32 (!%p1117_p2), %v845_v18, %v844_v20  ;;  %v849_v25 = vsel (!%p1117_p2), %vm839_vm3, %v747_v19, 0.0 }
 0x140   : > { %v847_v21 = vsel (!%p1117_p2), %vm839_vm3, %v746_v16, 0.0  ;;  %792 = vperm.xlu1 (!%p1117_p2), %1405, %v745_v11  }
 0x141   : > { %v1782_v45 = vpop.eup %1400  ;;  %v848_v27 = vadd.f32 (!%p1117_p2), %v847_v21, %v846_v24 }
 0x142   : > { %v749_v26 = vsel (!%p1117_p2), %vm741_vm10, %v1782_v45, 0.0 }
 0x143   : > { %v850_v29 = vadd.f32 (!%p1117_p2), %v849_v25, %v848_v27  ;;  %v853_v30 = vsel (!%p1117_p2), %vm839_vm3, %v749_v26, 0.0 }
 0x144   : > { %v1784_v53 = vpop.eup %1402  ;;  %797 = vperm.xlu1 (!%p1117_p2), %1405, %v746_v16  }
 0x145   : > { %v748_v23 = vsel %vm740_vm9, %v1784_v53, 0.0 }
 0x146   : > { %v851_v28 = vsel %vm839_vm3, %v748_v23, 0.0 }
 0x147   : > { %v852_v31 = vadd.f32 %v851_v28, %v850_v29 }
 0x148   : > { %802 = vperm.xlu1 %1405, %v747_v19  }
 0x149   : > { %v854_v32 = vadd.f32 %v853_v30, %v852_v31  ;;  %v774_v30 = vld [vmem:[#allocation2] sm:$0x1] }
 0x14b   : > { %855 = vadd.xlane.f32.xlu0 %v854_v32  ;;  %v838_v32 = vld [vmem:[#allocation3] sm:$0x1] }
 0x14c   : > { %807 = vperm.xlu1 %1405, %v748_v23  }
 0x150   : > { %812 = vperm.xlu1 %1405, %v749_v26  }
 0x161   : > { %777 = vperm.xlu0 %1404, %v742_v7  }
 0x1b6   : > { %v783_v33 = vpop.permute.xlu1 %782 }
 0x1b7   : > { %v816_v60 = vmul.f32 %v783_v33, %v767_v55 }
 0x1bb   : > { %v788_v34 = vpop.permute.xlu1 %787 }
 0x1bc   : > { %v817_v5 = vmul.f32 %v788_v34, %v768_v58 }
 0x1bf   : > { %v793_v35 = vpop.permute.xlu1 %792 }
 0x1c0   : > { %v818_v11 = vmul.f32 %v793_v35, %v769_v62 }
 0x1c3   : > { %v798_v37 = vpop.permute.xlu1 %797 }
 0x1c4   : > { %v819_v14 = vmul.f32 %v798_v37, %v770_v1 }
 0x1c7   : > { %v803_v56 = vpop.permute.xlu1 %802 }
 0x1c8   : > { %v820_v16 = vmul.f32 %v803_v56, %v771_v0 }
 0x1cb   : > { %v808_v10 = vpop.permute.xlu1 %807 }
 0x1cc   : > { %v821_v20 = vmul.f32 %v808_v10, %v772_v3 }
 0x1cf   : > { %v813_v18 = vpop.permute.xlu1 %812 }
 0x1d0   : > { %v822_v23 = vmul.f32 %v813_v18, %v773_v4 }
 0x1d8   : > { %v856_v39 = vpop.xlane.xlu0 %855 }
 0x1d9   : > { %v857_v40 = vrot.slane %v856_v39, 4 }
 0x1db   : > { %v858_v54 = vadd.f32 %v857_v40, %v856_v39 }
 0x1dd   : > { %v859_v57 = vrot.slane %v858_v54, 2 }
 0x1df   : > { %v860_v61 = vadd.f32 %v859_v57, %v858_v54 }
 0x1e0   : > { %v778_v63 = vpop.permute.xlu0 %777 }
 0x1e1   : > { %v815_v7 = vmul.f32 %v778_v63, %v766_v59  ;;  %v861_v9 = vrot.slane %v860_v61, 1 }
 0x1e3   : > { %v823_v2 = vadd.f32 %v816_v60, %v815_v7  ;;  %v862_v12 = vadd.f32 %v861_v9, %v860_v61 }
 0x1e5   : > { %v824_v15 = vadd.f32 %v823_v2, %v817_v5  ;;  %1294 = vpush %v862_v12 }
 0x1e7   : > { %v825_v17 = vadd.f32 %v824_v15, %v818_v11 }
 0x1e9   : > { %v826_v19 = vadd.f32 %v825_v17, %v819_v14 }
 0x1eb   : > { %v827_v21 = vadd.f32 %v826_v19, %v820_v16 }
 0x1ed   : > { %v828_v24 = vadd.f32 %v827_v21, %v821_v20 }
 0x1ef   : > { %v829_v6 = vadd.f32 %v828_v24, %v822_v23 }
 0x1f1   : > { %v830_v25 = vrot.slane %v829_v6, 4 }
 0x1f3   : > { %v831_v26 = vadd.f32 %v830_v25, %v829_v6 }
 0x1f5   : > { %v832_v27 = vrot.slane %v831_v26, 2 }
 0x1f7   : > { %v833_v28 = vadd.f32 %v832_v27, %v831_v26 }
 0x1f9   : > { %v834_v29 = vrot.slane %v833_v28, 1 }
 0x1fb   : > { %v835_v8 = vadd.f32 %v834_v29, %v833_v28 }
 0x1fd   : > { %v836_v31 = vadd.f32 %v835_v8, %v774_v30 }
 0x1ff   : > { %837 = vst [vmem:[#allocation2] sm:$0x1] %v836_v31 }
 0x216   : > { %s1295_s8 = spop %1294 }
 0x217   : > { %v864_v13 = vstv %s1295_s8 }
 0x218   : > { %v865_v33 = vadd.f32 %v864_v13, %v838_v32 }
 0x21a   : > { %867 = vst.msk [vmem:[#allocation3] sm:$0x1] %vm866_vm11, %v865_v33 }
 0x21b PF: > { %p1119_p4 = scmp.gt.s32.totalorder %s1768_s12, 200 }
 0x21c   : > { %vm937_vm12 = vcmask (!%p1119_p4), 7168   ;;  %v1506_v39 = vmov (!%p1119_p4), 0   ;;  %vm964_vm13 = vcmask (!%p1119_p4), 0  }
 0x21d   : > { %871 = sbr.rel (%p1119_p4) target bundleno = 764 (0x2fc), region = 52  ;;  %v938_v34 = vsel (!%p1119_p4), %vm937_vm12, %v1772_v38, 0.0  ;;  %v939_v35 = vsel (!%p1119_p4), %vm937_vm12, %v1770_v36, 0.0  ;;  %v941_v37 = vsel (!%p1119_p4), %vm937_vm12, %v1776_v42, 0.0  ;;  %1407 = vset.pattern.permute.xlu1 (!%p1119_p4), %v1506_v39  ;;  %1406 = vset.pattern.permute.xlu0 (!%p1119_p4), %v1506_v39  ;;  %v943_v54 = vsel (!%p1119_p4), %vm937_vm12, %v1774_v41, 0.0 }
 0x21e   : > { %v940_v40 = vadd.f32 (!%p1119_p4), %v939_v35, %v938_v34  ;;  %880 = vperm.xlu1 (!%p1119_p4), %1407, %v1770_v36   ;;  %v945_v56 = vsel (!%p1119_p4), %vm937_vm12, %v1780_v44, 0.0  ;;  %v947_v58 = vsel (!%p1119_p4), %vm937_vm12, %v1778_v43, 0.0  ;;  %v949_v60 = vsel (!%p1119_p4), %vm937_vm12, %v1784_v53, 0.0 }
 0x21f   : > { %v951_v36 = vsel (!%p1119_p4), %vm937_vm12, %v1782_v45, 0.0 }
 0x220   : > { %v942_v55 = vadd.f32 (!%p1119_p4), %v941_v37, %v940_v40 }
 0x221   : > { %v936_v29 = vld [vmem:[#allocation3] sm:$0x1] (!%p1119_p4) }
 0x222   : > { %v944_v57 = vadd.f32 (!%p1119_p4), %v943_v54, %v942_v55  ;;  %885 = vperm.xlu1 (!%p1119_p4), %1407, %v1776_v42  }
 0x224   : > { %v946_v59 = vadd.f32 %v945_v56, %v944_v57 }
 0x226   : > { %v948_v61 = vadd.f32 %v947_v58, %v946_v59  ;;  %890 = vperm.xlu1 %1407, %v1774_v41  }
 0x228   : > { %v950_v62 = vadd.f32 %v949_v60, %v948_v61 }
 0x22a   : > { %v952_v63 = vadd.f32 %v951_v36, %v950_v62  ;;  %895 = vperm.xlu1 %1407, %v1780_v44  }
 0x22c   : > { %953 = vadd.xlane.f32.xlu0 %v952_v63 }
 0x22e   : > { %900 = vperm.xlu1 %1407, %v1778_v43  }
 0x232   : > { %905 = vperm.xlu1 %1407, %v1784_v53  }
 0x236   : > { %910 = vperm.xlu1 %1407, %v1782_v45  }
 0x242   : > { %875 = vperm.xlu0 %1406, %v1772_v38  }
 0x29d   : > { %v881_v42 = vpop.permute.xlu1 %880 }
 0x29e   : > { %v914_v44 = vmul.f32 %v881_v42, %v1737_v46 }
 0x2a1   : > { %v886_v5 = vpop.permute.xlu1 %885 }
 0x2a2   : > { %v915_v43 = vmul.f32 %v886_v5, %v1740_v47 }
 0x2a5   : > { %v891_v7 = vpop.permute.xlu1 %890 }
 0x2a6   : > { %v916_v38 = vmul.f32 %v891_v7, %v1746_v48 }
 0x2a9   : > { %v896_v41 = vpop.permute.xlu1 %895 }
 0x2aa   : > { %v917_v16 = vmul.f32 %v896_v41, %v1749_v49  ;;  %v872_v49 = vld [vmem:[#allocation2] sm:$0x1] }
 0x2ad   : > { %v901_v11 = vpop.permute.xlu1 %900 }
 0x2ae   : > { %v918_v18 = vmul.f32 %v901_v11, %v1754_v50 }
 0x2b1   : > { %v906_v14 = vpop.permute.xlu1 %905 }
 0x2b2   : > { %v919_v20 = vmul.f32 %v906_v14, %v1757_v51 }
 0x2b5   : > { %v911_v46 = vpop.permute.xlu1 %910 }
 0x2b9   : > { %v954_v9 = vpop.xlane.xlu0 %953 }
 0x2ba   : > { %v955_v1 = vrot.slane %v954_v9, 4 }
 0x2bc   : > { %v956_v10 = vadd.f32 %v955_v1, %v954_v9 }
 0x2be   : > { %v957_v2 = vrot.slane %v956_v10, 2 }
 0x2c0   : > { %v958_v12 = vadd.f32 %v957_v2, %v956_v10 }
 0x2c1   : > { %v876_v0 = vpop.permute.xlu0 %875 }
 0x2c2   : > { %v913_v53 = vmul.f32 %v876_v0, %v1689_v22  ;;  %v959_v45 = vrot.slane %v958_v12, 1  ;;  %v920_v22 = vmul.f32 %v911_v46, %v1762_v52 }
 0x2c4   : > { %v921_v15 = vadd.f32 %v914_v44, %v913_v53  ;;  %v960_v3 = vadd.f32 %v959_v45, %v958_v12 }
 0x2c6   : > { %v922_v17 = vadd.f32 %v921_v15, %v915_v43  ;;  %1296 = vpush %v960_v3 }
 0x2c8   : > { %v923_v4 = vadd.f32 %v922_v17, %v916_v38 }
 0x2ca   : > { %v924_v19 = vadd.f32 %v923_v4, %v917_v16 }
 0x2cc   : > { %v925_v47 = vadd.f32 %v924_v19, %v918_v18 }
 0x2ce   : > { %v926_v21 = vadd.f32 %v925_v47, %v919_v20 }
 0x2d0   : > { %v927_v23 = vadd.f32 %v926_v21, %v920_v22 }
 0x2d2   : > { %v928_v24 = vrot.slane %v927_v23, 4 }
 0x2d4   : > { %v929_v48 = vadd.f32 %v928_v24, %v927_v23 }
 0x2d6   : > { %v930_v6 = vrot.slane %v929_v48, 2 }
 0x2d8   : > { %v931_v25 = vadd.f32 %v930_v6, %v929_v48 }
 0x2da   : > { %v932_v26 = vrot.slane %v931_v25, 1 }
 0x2dc   : > { %v933_v27 = vadd.f32 %v932_v26, %v931_v25 }
 0x2de   : > { %v934_v28 = vadd.f32 %v933_v27, %v872_v49 }
 0x2e0   : > { %935 = vst [vmem:[#allocation2] sm:$0x1] %v934_v28 }
 0x2f7   : > { %s1297_s17 = spop %1296 }
 0x2f8   : > { %v962_v50 = vstv %s1297_s17 }
 0x2f9   : > { %v963_v30 = vadd.f32 %v962_v50, %v936_v29 }
 0x2fb   : > { %965 = vst.msk [vmem:[#allocation3] sm:$0x1] %vm964_vm13, %v963_v30 }
 0x2fc PF: > { %p1120_p5 = scmp.ne.s32.totalorder %s1486_s26, 1 }
 0x2fd   : > { %v970_v51 = vld [vmem:[#allocation2] sm:$0x1] (!%p1120_p5)  ;;  %vm973_vm14 = vcmask (!%p1120_p5), 0  }
 0x2fe   : > { %969 = sbr.rel (%p1120_p5) target bundleno = 773 (0x305), region = 56  ;;  %971 = vst [vmem:[%s1642_s28] sm:$0x1] (!%p1120_p5), %v970_v51 }
 0x302   : > { %v972_v52 = vld [vmem:[#allocation3] sm:$0x1] (!%p1120_p5) }
 0x303   : > { %974 = vst.msk [vmem:[%s390_s4] sm:$0x1] (!%p1120_p5), %vm973_vm14, %v972_v52 }
 0x305 PF: > { %s1121_s21 = sshll.u32 %s1490_s27, 4  ;;  %s991_s15 = sshll.u32 %s1642_s28, 4  ;;  %s992_s15 = int_to_ptr.vmem [resolvable:$true] %s991_s15 }
 0x306   : > { %s1888_s9 = scalar_lea.hbm %s1943_s5, %s1121_s21  ;;  %s1955_s29 = sand.u32 1, %s1478_s24  }
 0x307   : > { %s976_s7 = scalar_lea.sflag [#allocation6], %s1955_s29  ;;  %s1408_s16 = scalar_lea.vmem %s992_s15, 16 }
 0x308   : > { %p1409_p6 = scmp.ne.s32.totalorder %s992_s15, %s1408_s16  ;;  %s1507_s19 = smov [#allocation5]  }
 0x309   : > { %s1412_s4 = sshll.u32 %s1507_s19, 4  ;;  %s1413_s4 = int_to_ptr.vmem [resolvable:$false] %s1412_s4 }
 0x30a   : > { %p1410_p7 = pnand %p1409_p6, %p1595_p3  ;;  %s1414_s12 = scalar_lea.vmem %s1413_s4, 32 }
 0x30b   : > { %p1415_p10 = scmp.lt.s32.totalorder %s992_s15, %s1413_s4  ;;  %p1416_p11 = scmp.lt.s32.totalorder %s1414_s12, %s1408_s16 }
 0x30c   : > { %p1411_p8 = pneg %p1410_p7 }
 0x30d   : > { %p1417_p12 = por %p1416_p11, %p1415_p10 }
 0x30f   : > { %p1418_p13 = pnand %p1417_p12, %p1411_p8 }
 0x311   : > { %1421 = shalt.err (!%p1418_p13)
}
 0x312   : > { %s1422_s27 = scalar_lea.hbm %s1888_s9, 16  ;;  %s1426_s8 = scalar_lea.hbm %s1943_s5, 32 }
 0x313   : > { %p1423_p0 = scmp.ne.s32.totalorder %s1888_s9, %s1422_s27  ;;  %p1427_p4 = scmp.lt.u32.totalorder %s1888_s9, %s1943_s5 }
 0x314   : > { %p1428_p5 = scmp.lt.u32.totalorder %s1426_s8, %s1422_s27  ;;  %p1430_p7 = scmp.lt.u32.totalorder %s1422_s27, %s1888_s9 }
 0x315   : > { %p1424_p1 = pnand %p1423_p0, %p1595_p3 }
 0x316   : > { %p1429_p6 = por %p1428_p5, %p1427_p4 }
 0x317   : > { %p1425_p2 = pneg %p1424_p1 }
 0x318   : > { %p1431_p8 = por %p1430_p7, %p1429_p6 }
 0x31a   : > { %p1432_p10 = pnand %p1431_p8, %p1425_p2 }
 0x31c   : > { %1435 = shalt.err (!%p1432_p10)
}
 0x31d   : > { %1298 = dma.vmem_to_hbm [thread:$0]  (%p1595_p3), %s992_s15, 16, %s1888_s9, %s976_s7  }
 0x31e PF: > { %p1304_p11 = scmp.ge.s32.totalorder %s1502_s30, 2  ;;  %s1006_s20 = sand.u32 1, %s1474_s23  }
 0x31f   : > { %s1007_s21 = scalar_lea.sflag [#allocation6], %s1006_s20 }
 0x320   : > { %p1301_p12 = pnand %p1304_p11, %p1605_p9 }
 0x322   : > { %1469 = dma.done.wait (!%p1301_p12), %s1007_s21, 16  }
 0x323   : > { %1471 = vsyncadd (!%p1301_p12), %s1007_s21, 4294967280  ;;  %s21_s30 = sadd.s32 1, %s1502_s30   ;;  %s1956_s26 = sld [smem:[#allocation8_spill]] }
 0x324   : > { %p18_p13 = scmp.ge.s32.totalorder %s21_s30, 6   ;;  %s1957_s27 = sld [smem:[#allocation9_spill]] }
 0x325   : > { %s1958_s28 = sld [smem:[#allocation10_spill]]  ;;  %s1959_s29 = sld [smem:[#allocation11_spill]] }
 0x326   : > { %s1960_s23 = smov %s1478_s24  ;;  %s1961_s24 = smov %s1482_s25 }
 0x327   : > { %s1962_s25 = smov %s1613_s14  ;;  %20 = sbr.rel (!%p18_p13) target bundleno = 7 (0x7), region = 106 }
 0x32e   :  { %1017 = vsyncpa [#allocation6], 1 }
 0x32f   :  { %1019 = vsyncpa [#allocation6 + $0x1], 1 }

</bundles_post_ra>
